<compile_context>
chip_gen: v5e
topology: v5e:2x2
jax: 0.10.0
libtpu: 0.0.40
codegen_flags: <defaults>
</compile_context>

<pallas_src>
import functools
import math

import jax
import jax.numpy as jnp
from jax import lax
from jax.experimental import pallas as pl
from jax.experimental.pallas import tpu as pltpu


_COMPUTE_DTYPE = jnp.bfloat16          # MXU input dtype (accumulate in f32)


@functools.lru_cache(maxsize=1)
def _vmem_limit_bytes():
    """Generation-aware scoped-VMEM budget: ~75% of physical VMEM.

    v7x (64 MiB) -> 48 MiB, v5e/v6e (128 MiB) -> 96 MiB."""
    try:
        cap = pltpu.get_tpu_info().vmem_capacity_bytes
    except Exception:
        cap = 64 * 1024 * 1024
    return int(min(cap * 3 // 4, 100 * 1024 * 1024))


def _pick_tile(dim, target, align):
    """Largest tile <= target that divides `dim` and is `align`-aligned.

    Falls back to the full dimension (a full-extent block is always legal)."""
    if dim <= target:
        return dim
    t = (target // align) * align
    while t >= align:
        if dim % t == 0:
            return t
        t -= align
    return dim


# ---------------------------------------------------------------------------
# Tiled matmul kernel (projections)
# ---------------------------------------------------------------------------

def _matmul_kernel(x_ref, w_ref, o_ref, acc_ref):
    @pl.when(pl.program_id(2) == 0)
    def _init():
        acc_ref[...] = jnp.zeros_like(acc_ref)

    acc_ref[...] += jnp.dot(
        x_ref[...], w_ref[...], preferred_element_type=jnp.float32)

    @pl.when(pl.program_id(2) == pl.num_programs(2) - 1)
    def _store():
        o_ref[...] = acc_ref[...].astype(o_ref.dtype)


def pallas_matmul(x, w, out_dtype=jnp.float32, tm=512, tn=None, tk=512):
    """x: [M, K] @ w: [K, N] -> [M, N], MXU matmul with f32 accumulation.

    tn defaults to the full N (projection N's are small) so the activation
    block is DMAed from HBM exactly once."""
    M, K = x.shape
    K2, N = w.shape
    assert K == K2, (x.shape, w.shape)
    tm = _pick_tile(M, tm, 8)
    tk = _pick_tile(K, tk, 128)
    tn = N if tn is None else _pick_tile(N, tn, 128)
    grid = (M // tm, N // tn, K // tk)
    return pl.pallas_call(
        _matmul_kernel,
        out_shape=jax.ShapeDtypeStruct((M, N), out_dtype),
        grid_spec=pltpu.PrefetchScalarGridSpec(
            num_scalar_prefetch=0,
            grid=grid,
            in_specs=[
                pl.BlockSpec((tm, tk), lambda i, j, k: (i, k)),
                pl.BlockSpec((tk, tn), lambda i, j, k: (k, j)),
            ],
            out_specs=pl.BlockSpec((tm, tn), lambda i, j, k: (i, j)),
            scratch_shapes=[pltpu.VMEM((tm, tn), jnp.float32)],
        ),
        compiler_params=pltpu.CompilerParams(
            dimension_semantics=("parallel", "parallel", "arbitrary"),
            vmem_limit_bytes=_vmem_limit_bytes(),
        ),
    )(x, w)


# ---------------------------------------------------------------------------
# Flash-style attention kernel (default path: no weights materialized)
# ---------------------------------------------------------------------------

def _flash_attn_kernel(*refs, n_heads, d_k, d_v, has_mask):
    if has_mask:
        q_ref, k_ref, v_ref, mask_ref, o_ref, q_sc, m_sc, l_sc, acc_sc = refs
    else:
        q_ref, k_ref, v_ref, o_ref, q_sc, m_sc, l_sc, acc_sc = refs
        mask_ref = None

    kv_i = pl.program_id(2)

    @pl.when(kv_i == 0)
    def _init():
        m_sc[...] = jnp.full(m_sc.shape, -1e30, m_sc.dtype)
        l_sc[...] = jnp.zeros(l_sc.shape, l_sc.dtype)
        acc_sc[...] = jnp.zeros(acc_sc.shape, acc_sc.dtype)
        # Cache per-head q slices once per q tile: q is invariant across the
        # KV grid axis and the 32-lane slices of the packed [tq, H*d_k] block
        # are relayout-heavy -> do them once, not every KV step x head.
        # 1/sqrt(d_k) is already folded into W_Q, so no scaling here.
        for h in range(n_heads):
            q_sc[h] = q_ref[0, :, h * d_k:(h + 1) * d_k].astype(_COMPUTE_DTYPE)

    if has_mask:
        # One additive f32 bias per (b, q_tile, kv_tile), shared by all heads.
        mf = mask_ref[0].astype(jnp.float32)
        bias = jnp.where(mf == 0.0, jnp.float32(-1e9), jnp.float32(0.0))

    for h in range(n_heads):
        k_h = k_ref[0, :, h * d_k:(h + 1) * d_k].astype(_COMPUTE_DTYPE)
        v_h = v_ref[0, :, h * d_v:(h + 1) * d_v].astype(_COMPUTE_DTYPE)

        # q @ k^T without an explicit transpose of the K tile.
        s = lax.dot_general(
            q_sc[h], k_h, dimension_numbers=(((1,), (1,)), ((), ())),
            preferred_element_type=jnp.float32)             # [tq, tkv] f32
        if has_mask:
            s = s + bias

        m_prev = m_sc[h]                                    # [tq, 1]
        m_new = jnp.maximum(m_prev, jnp.max(s, axis=-1, keepdims=True))
        alpha = jnp.exp(m_prev - m_new)
        p = jnp.exp(s - m_new)                              # [tq, tkv] f32
        l_sc[h] = alpha * l_sc[h] + jnp.sum(p, axis=-1, keepdims=True)
        acc_sc[h] = alpha * acc_sc[h] + jnp.dot(
            p.astype(_COMPUTE_DTYPE), v_h, preferred_element_type=jnp.float32)
        m_sc[h] = m_new

    @pl.when(kv_i == pl.num_programs(2) - 1)
    def _finalize():
        # Assemble the whole [tq, H*d_v] row block and do ONE lane-dense
        # store instead of H separate 32-lane masked stores.
        outs = []
        for h in range(n_heads):
            inv = pl.reciprocal(l_sc[h], approx=True)       # EUP slot
            outs.append(acc_sc[h] * inv)
        o_ref[0] = jnp.concatenate(outs, axis=-1).astype(o_ref.dtype)


def _q_map3(col):
    return lambda b, qi, ki: (b, qi, col)


def _kv_map3(col):
    return lambda b, qi, ki: (b, ki, col)


def pallas_flash_attention(q, k, v, mask, n_heads, d_k, d_v,
                           out_dtype=_COMPUTE_DTYPE,
                           q_col=0, k_col=0, v_col=0, tq=256, tkv=512):
    """Flash attention over [B, S, H*d]-packed q/k/v.

    q/k/v may all be the same fused QKV buffer; `*_col` are block indices
    along the last dim (block widths H*d_k / H*d_k / H*d_v).  mask is
    [B, Sq, Skv] int8 (0 = masked) or None.  Returns [B, Sq, H*d_v]."""
    B, Sq, _ = q.shape
    Skv = k.shape[1]
    hdk = n_heads * d_k
    hdv = n_heads * d_v
    tq = _pick_tile(Sq, tq, 8)
    tkv = _pick_tile(Skv, tkv, 128)
    # v7x shards the parallel grid axes across 2 TensorCores: try to give the
    # parallel axes at least 2 iterations so one core does not idle.
    while B * (Sq // tq) < 2 and tq > 8:
        smaller = _pick_tile(Sq, max(tq // 2, 8), 8)
        if smaller >= tq:
            break
        tq = smaller
    grid = (B, Sq // tq, Skv // tkv)

    in_specs = [
        pl.BlockSpec((1, tq, hdk), _q_map3(q_col)),
        pl.BlockSpec((1, tkv, hdk), _kv_map3(k_col)),
        pl.BlockSpec((1, tkv, hdv), _kv_map3(v_col)),
    ]
    args = [q, k, v]
    if mask is not None:
        in_specs.append(
            pl.BlockSpec((1, tq, tkv), lambda b, qi, ki: (b, qi, ki)))
        args.append(mask)

    kernel = functools.partial(
        _flash_attn_kernel, n_heads=n_heads, d_k=d_k, d_v=d_v,
        has_mask=mask is not None)

    return pl.pallas_call(
        kernel,
        out_shape=jax.ShapeDtypeStruct((B, Sq, hdv), out_dtype),
        grid_spec=pltpu.PrefetchScalarGridSpec(
            num_scalar_prefetch=0,
            grid=grid,
            in_specs=in_specs,
            out_specs=pl.BlockSpec((1, tq, hdv), lambda b, qi, ki: (b, qi, 0)),
            scratch_shapes=[
                pltpu.VMEM((n_heads, tq, d_k), _COMPUTE_DTYPE),  # cached q
                pltpu.VMEM((n_heads, tq, 1), jnp.float32),       # running max
                pltpu.VMEM((n_heads, tq, 1), jnp.float32),       # running denom
                pltpu.VMEM((n_heads, tq, d_v), jnp.float32),     # running out
            ],
        ),
        compiler_params=pltpu.CompilerParams(
            dimension_semantics=("parallel", "parallel", "arbitrary"),
            vmem_limit_bytes=_vmem_limit_bytes(),
        ),
    )(*args)


# ---------------------------------------------------------------------------
# Attention kernel that also emits softmax weights (opt-in, small S only)
# ---------------------------------------------------------------------------

def _attn_with_weights_kernel(*refs, n_heads, d_k, d_v, has_mask):
    if has_mask:
        q_ref, k_ref, v_ref, mask_ref, o_ref, w_ref = refs
    else:
        q_ref, k_ref, v_ref, o_ref, w_ref = refs
        mask_ref = None

    if has_mask:
        mf = mask_ref[0].astype(jnp.float32)
        bias = jnp.where(mf == 0.0, jnp.float32(-1e9), jnp.float32(0.0))

    outs = []
    for h in range(n_heads):
        q = q_ref[0, :, h * d_k:(h + 1) * d_k].astype(_COMPUTE_DTYPE)
        k = k_ref[0, :, h * d_k:(h + 1) * d_k].astype(_COMPUTE_DTYPE)
        v = v_ref[0, :, h * d_v:(h + 1) * d_v].astype(_COMPUTE_DTYPE)

        s = lax.dot_general(
            q, k, dimension_numbers=(((1,), (1,)), ((), ())),
            preferred_element_type=jnp.float32)             # [tq, Skv] f32
        if has_mask:
            s = s + bias
        m = jnp.max(s, axis=-1, keepdims=True)
        p = jnp.exp(s - m)
        weights = p / jnp.sum(p, axis=-1, keepdims=True)     # exact softmax
        w_ref[0, h] = weights.astype(w_ref.dtype)
        outs.append(jnp.dot(weights.astype(_COMPUTE_DTYPE), v,
                            preferred_element_type=jnp.float32))
    o_ref[0] = jnp.concatenate(outs, axis=-1).astype(o_ref.dtype)


def _q_map2(col):
    return lambda b, qi: (b, qi, col)


def _kv_map2(col):
    return lambda b, qi: (b, 0, col)


def pallas_attention_with_weights(q, k, v, mask, n_heads, d_k, d_v,
                                  out_dtype=_COMPUTE_DTYPE,
                                  weights_dtype=jnp.float32,
                                  q_col=0, k_col=0, v_col=0, tq=128):
    """Attention that also materializes [B, H, Sq, Skv] softmax weights."""
    B, Sq, _ = q.shape
    Skv = k.shape[1]
    hdk = n_heads * d_k
    hdv = n_heads * d_v
    tq = _pick_tile(Sq, tq, 8)
    # Keep the (double-buffered) weights output block inside the VMEM budget
    # (matters on v7x's 64 MiB part for long Skv) by shrinking tq.
    w_itemsize = jnp.dtype(weights_dtype).itemsize
    budget = _vmem_limit_bytes() // 3
    while tq > 8 and n_heads * tq * Skv * w_itemsize * 2 > budget:
        smaller = _pick_tile(Sq, max(tq // 2, 8), 8)
        if smaller >= tq:
            break
        tq = smaller
    grid = (B, Sq // tq)

    in_specs = [
        pl.BlockSpec((1, tq, hdk), _q_map2(q_col)),
        pl.BlockSpec((1, Skv, hdk), _kv_map2(k_col)),
        pl.BlockSpec((1, Skv, hdv), _kv_map2(v_col)),
    ]
    args = [q, k, v]
    if mask is not None:
        in_specs.append(pl.BlockSpec((1, tq, Skv), lambda b, qi: (b, qi, 0)))
        args.append(mask)

    kernel = functools.partial(
        _attn_with_weights_kernel, n_heads=n_heads, d_k=d_k, d_v=d_v,
        has_mask=mask is not None)

    return pl.pallas_call(
        kernel,
        out_shape=(
            jax.ShapeDtypeStruct((B, Sq, hdv), out_dtype),
            jax.ShapeDtypeStruct((B, n_heads, Sq, Skv), weights_dtype),
        ),
        grid_spec=pltpu.PrefetchScalarGridSpec(
            num_scalar_prefetch=0,
            grid=grid,
            in_specs=in_specs,
            out_specs=(
                pl.BlockSpec((1, tq, hdv), lambda b, qi: (b, qi, 0)),
                pl.BlockSpec((1, n_heads, tq, Skv), lambda b, qi: (b, 0, qi, 0)),
            ),
        ),
        compiler_params=pltpu.CompilerParams(
            dimension_semantics=("parallel", "parallel"),
            vmem_limit_bytes=_vmem_limit_bytes(),
        ),
    )(*args)


# ---------------------------------------------------------------------------
# MultiHeadAttention module (parameters + forward glue)
# ---------------------------------------------------------------------------

class MultiHeadAttentionPallas:
    """Pallas-TPU forward pass matching the PyTorch MultiHeadAttention
    (eval-mode semantics; dropout is a no-op)."""

    def __init__(self, n_heads, d_model, d_k, d_v, dropout, key):
        self.n_heads = n_heads
        self.d_model = d_model
        self.d_k = d_k
        self.d_v = d_v
        self.dropout_p = dropout  # eval-mode: no-op
        # TODO(synk): training-mode dropout on attention weights not implemented.

        kq, kk, kv, ko = jax.random.split(key, 4)

        def init(k, fan_in, fan_out):
            # torch nn.Linear default init: U(-1/sqrt(in), 1/sqrt(in)),
            # stored already transposed as [in_features, out_features].
            bound = 1.0 / math.sqrt(fan_in)
            return jax.random.uniform(k, (fan_in, fan_out), jnp.float32,
                                      -bound, bound)

        w_q = init(kq, d_model, d_k * n_heads)
        w_k = init(kk, d_model, d_k * n_heads)
        w_v = init(kv, d_model, d_v * n_heads)
        w_o = init(ko, d_v * n_heads, d_model)
        scale = 1.0 / math.sqrt(d_k)

        # Raw weights stored bf16 (MXU fast path + half the DMA).
        self.W_Q = w_q.astype(_COMPUTE_DTYPE)
        self.W_K = w_k.astype(_COMPUTE_DTYPE)
        self.W_V = w_v.astype(_COMPUTE_DTYPE)
        self.W_O = w_o.astype(_COMPUTE_DTYPE)

        # Kernel weights: 1/sqrt(d_k) folded into the q projection so the
        # attention kernels never rescale q / s.
        self._W_Q_scaled = (w_q * scale).astype(_COMPUTE_DTYPE)

        # Fused [Q|K|V] projection weight for self-attention; the attention
        # kernel reads q/k/v straight from the fused buffer via block offsets
        # (requires equal block widths and lane alignment).
        self._fuse_qkv = (d_k == d_v) and ((n_heads * d_k) % 128 == 0)
        if self._fuse_qkv:
            self._W_QKV_scaled = jnp.concatenate(
                [w_q * scale, w_k, w_v], axis=1).astype(_COMPUTE_DTYPE)

        self.attn_weights = None

    def __call__(self, key_in, query_in, value_in, mask=None,
                 store_attn_weights=False):
        B, Sk, _ = key_in.shape
        Sq = query_in.shape[1]
        H, dk, dv = self.n_heads, self.d_k, self.d_v
        cdt = _COMPUTE_DTYPE

        # int8 mask: 4x less HBM traffic than int32 (O(B*S^2) term).
        mask_i = None if mask is None else (mask != 0).astype(jnp.int8)

        # ---- projections (tiled Pallas matmul kernels) ----
        self_attn = (query_in is key_in) and (key_in is value_in)
        if self_attn and self._fuse_qkv:
            x = query_in.reshape(B * Sq, self.d_model).astype(cdt)
            qkv = pallas_matmul(x, self._W_QKV_scaled, out_dtype=cdt)
            qkv = qkv.reshape(B, Sq, 3 * H * dk)
            q_p, k_p, v_p = qkv, qkv, qkv      # same buffer, column offsets
            cols = (0, 1, 2)
        else:
            q_p = pallas_matmul(
                query_in.reshape(B * Sq, self.d_model).astype(cdt),
                self._W_Q_scaled, out_dtype=cdt).reshape(B, Sq, H * dk)
            k_p = pallas_matmul(
                key_in.reshape(B * Sk, self.d_model).astype(cdt),
                self.W_K, out_dtype=cdt).reshape(B, Sk, H * dk)
            v_p = pallas_matmul(
                value_in.reshape(B * Sk, self.d_model).astype(cdt),
                self.W_V, out_dtype=cdt).reshape(B, Sk, H * dv)
            cols = (0, 0, 0)

        # ---- scaled dot-product attention (Pallas kernels) ----
        if store_attn_weights:
            attn_vec, attn_w = pallas_attention_with_weights(
                q_p, k_p, v_p, mask_i, H, dk, dv, out_dtype=cdt,
                q_col=cols[0], k_col=cols[1], v_col=cols[2])
            self.attn_weights = attn_w
        else:
            attn_vec = pallas_flash_attention(
                q_p, k_p, v_p, mask_i, H, dk, dv, out_dtype=cdt,
                q_col=cols[0], k_col=cols[1], v_col=cols[2])
            self.attn_weights = None   # not materialized on the flash path

        # ---- output projection (f32 to match PyTorch module output dtype;
        #      switch out_dtype to bf16 if the consumer tolerates it) ----
        out = pallas_matmul(attn_vec.reshape(B * Sq, H * dv), self.W_O,
                            out_dtype=jnp.float32)
        return out.reshape(B, Sq, self.d_model)


# ---------------------------------------------------------------------------
# Pure-jnp reference (f32) for a sanity check
# ---------------------------------------------------------------------------

def _reference_mha(mha, key_in, query_in, value_in, mask):
    H, dk, dv = mha.n_heads, mha.d_k, mha.d_v
    B, Sk, _ = key_in.shape
    Sq = query_in.shape[1]
    Wq = mha.W_Q.astype(jnp.float32)
    Wk = mha.W_K.astype(jnp.float32)
    Wv = mha.W_V.astype(jnp.float32)
    Wo = mha.W_O.astype(jnp.float32)
    q = (query_in @ Wq).reshape(B, Sq, H, dk).transpose(0, 2, 1, 3)
    k = (key_in @ Wk).reshape(B, Sk, H, dk).transpose(0, 2, 1, 3)
    v = (value_in @ Wv).reshape(B, Sk, H, dv).transpose(0, 2, 1, 3)
    s = jnp.einsum("bhqd,bhkd->bhqk", q, k) / math.sqrt(dk)
    if mask is not None:
        s = jnp.where(mask[:, None, :, :] == 0, -1e9, s)
    w = jax.nn.softmax(s, axis=-1)
    o = jnp.einsum("bhqk,bhkd->bhqd", w, v)
    o = o.transpose(0, 2, 1, 3).reshape(B, Sq, H * dv)
    return o @ Wo, w


# ---------------------------------------------------------------------------
# Demo
# ---------------------------------------------------------------------------

if __name__ == "__main__":
    root = jax.random.PRNGKey(0)
    k_params, kx, kk_, kq_, kv_ = jax.random.split(root, 5)

    # Small shapes consistent with the module.
    B, S, d_model = 2, 8, 128
    n_heads, d_k, d_v = 4, 32, 32

    mha = MultiHeadAttentionPallas(
        n_heads=n_heads, d_model=d_model, d_k=d_k, d_v=d_v,
        dropout=0.0, key=k_params)

    x = jax.random.normal(kx, (B, S, d_model), dtype=jnp.float32)
    causal = jnp.repeat(
        jnp.tril(jnp.ones((S, S), dtype=jnp.int32))[None], B, axis=0)

    # 1) self-attention: fused QKV projection + flash attention (no weights).
    out_self = jax.block_until_ready(mha(x, x, x, causal))
    assert out_self.shape == (B, S, d_model)
    assert mha.attn_weights is None
    ref_self, _ = _reference_mha(mha, x, x, x, causal)
    assert jnp.allclose(out_self, ref_self, atol=7.5e-2, rtol=7.5e-2), \
        float(jnp.max(jnp.abs(out_self - ref_self)))

    # 2) cross-attention with attention weights requested.
    key_in = jax.random.normal(kk_, (B, S, d_model), dtype=jnp.float32)
    query_in = jax.random.normal(kq_, (B, S, d_model), dtype=jnp.float32)
    value_in = jax.random.normal(kv_, (B, S, d_model), dtype=jnp.float32)
    out_cross = jax.block_until_ready(
        mha(key_in, query_in, value_in, causal, store_attn_weights=True))
    attn_w = jax.block_until_ready(mha.attn_weights)
    assert out_cross.shape == (B, S, d_model)
    assert attn_w.shape == (B, n_heads, S, S)
    assert jnp.allclose(jnp.sum(attn_w, axis=-1), 1.0, atol=1e-2)
    ref_cross, ref_w = _reference_mha(mha, key_in, query_in, value_in, causal)
    assert jnp.allclose(out_cross, ref_cross, atol=7.5e-2, rtol=7.5e-2)
    assert jnp.allclose(attn_w, ref_w, atol=5e-2)

    # 3) no-mask path (flash kernel variant without a mask input).
    out_nomask = jax.block_until_ready(mha(x, x, x, None))
    assert out_nomask.shape == (B, S, d_model)

    print("KERNEL_OK")
</pallas_src>

<mosaic_0001>
module attributes {stable_mosaic.version = 11 : i64} {
  func.func @_matmul_kernel(%arg0: i32, %arg1: i32, %arg2: i32, %arg3: memref<16x128xbf16, #tpu.memory_space<vmem>>, %arg4: memref<128x384xbf16, #tpu.memory_space<vmem>>, %arg5: memref<16x384xbf16, #tpu.memory_space<vmem>>, %arg6: memref<16x384xf32, #tpu.memory_space<vmem>>) attributes {dimension_semantics = [#tpu.dimension_semantics<parallel>, #tpu.dimension_semantics<parallel>, #tpu.dimension_semantics<arbitrary>], iteration_bounds = array<i64: 1, 1, 1>, scalar_prefetch = 0 : i64, scratch_operands = 1 : i64, tpu.core_type = #tpu.core_type<tc>, window_params = [{transform_indices = @transform_0, window_bounds = array<i64: 16, 128>}, {transform_indices = @transform_1, window_bounds = array<i64: 128, 384>}, {transform_indices = @transform_2, window_bounds = array<i64: 16, 384>}]} {
    %c0_i32 = arith.constant 0 : i32
    %0 = arith.cmpi eq, %arg2, %c0_i32 : i32
    %1 = arith.extui %0 : i1 to i32
    %c0_i32_0 = arith.constant 0 : i32
    %2 = arith.cmpi ne, %1, %c0_i32_0 : i32
    scf.if %2 {
      %cst_10 = arith.constant 0.000000e+00 : f32
      %12 = vector.broadcast %cst_10 : f32 to vector<16x384xf32>
      %c0_11 = arith.constant 0 : index
      %c0_12 = arith.constant 0 : index
      %13 = vector.load %arg6[%c0_11, %c0_12] : memref<16x384xf32, #tpu.memory_space<vmem>>, vector<16x384xf32>
      tpu.vector_store %arg6[%c0_11, %c0_12], %12 {strides = array<i32>} : memref<16x384xf32, #tpu.memory_space<vmem>>, vector<16x384xf32>,
    } else {
    }
    %c0 = arith.constant 0 : index
    %c0_1 = arith.constant 0 : index
    %3 = vector.load %arg6[%c0, %c0_1] : memref<16x384xf32, #tpu.memory_space<vmem>>, vector<16x384xf32>
    %c0_2 = arith.constant 0 : index
    %c0_3 = arith.constant 0 : index
    %4 = vector.load %arg3[%c0_2, %c0_3] : memref<16x128xbf16, #tpu.memory_space<vmem>>, vector<16x128xbf16>
    %c0_4 = arith.constant 0 : index
    %c0_5 = arith.constant 0 : index
    %5 = vector.load %arg4[%c0_4, %c0_5] : memref<128x384xbf16, #tpu.memory_space<vmem>>, vector<128x384xbf16>
    %cst = arith.constant dense<0.000000e+00> : vector<16x384xf32>
    %6 = tpu.matmul %4, %5, %cst {dimension_numbers = #tpu.dot_dimension_numbers<[1], [0], [0], [1], [0, 0, 1, 1], [], []>} : vector<16x128xbf16>, vector<128x384xbf16>, vector<16x384xf32> -> vector<16x384xf32>
    %7 = arith.addf %3, %6 : vector<16x384xf32>
    %c0_6 = arith.constant 0 : index
    %c0_7 = arith.constant 0 : index
    %8 = vector.load %arg6[%c0_6, %c0_7] : memref<16x384xf32, #tpu.memory_space<vmem>>, vector<16x384xf32>
    tpu.vector_store %arg6[%c0_6, %c0_7], %7 {strides = array<i32>} : memref<16x384xf32, #tpu.memory_space<vmem>>, vector<16x384xf32>,
    %c0_i32_8 = arith.constant 0 : i32
    %9 = arith.cmpi eq, %arg2, %c0_i32_8 : i32
    %10 = arith.extui %9 : i1 to i32
    %c0_i32_9 = arith.constant 0 : i32
    %11 = arith.cmpi ne, %10, %c0_i32_9 : i32
    scf.if %11 {
      %c0_10 = arith.constant 0 : index
      %c0_11 = arith.constant 0 : index
      %12 = vector.load %arg6[%c0_10, %c0_11] : memref<16x384xf32, #tpu.memory_space<vmem>>, vector<16x384xf32>
      %13 = arith.truncf %12 : vector<16x384xf32> to vector<16x384xbf16>
      %c0_12 = arith.constant 0 : index
      %c0_13 = arith.constant 0 : index
      %14 = vector.load %arg5[%c0_12, %c0_13] : memref<16x384xbf16, #tpu.memory_space<vmem>>, vector<16x384xbf16>
      tpu.vector_store %arg5[%c0_12, %c0_13], %13 {strides = array<i32>} : memref<16x384xbf16, #tpu.memory_space<vmem>>, vector<16x384xbf16>,
    } else {
    }
    return
  }
  func.func @transform_0(%arg0: i32, %arg1: i32, %arg2: i32) -> (i32, i32) {
    %c0_i32 = arith.constant 0 : i32
    return %arg0, %arg2 : i32, i32
  }
  func.func @transform_1(%arg0: i32, %arg1: i32, %arg2: i32) -> (i32, i32) {
    %c0_i32 = arith.constant 0 : i32
    return %arg2, %arg1 : i32, i32
  }
  func.func @transform_2(%arg0: i32, %arg1: i32, %arg2: i32) -> (i32, i32) {
    %c0_i32 = arith.constant 0 : i32
    return %arg0, %arg1 : i32, i32
  }
}

</mosaic_0001>

<bundles_post_ra>
// kernel: tpu_custom_call.1
= control target key start
LH: loop header
LB: loop body
LE: loop exit
PB: predicated region body
PF: predicated region fallthrough
CT: control target
= control target key end

     0   :  { %7 = vsyncpa [#allocation4], 0  ;;  %s566_s0 = inlined_call_operand.hbm [shape: bf16[16,128], index: 0, kind: input, shape index: {}]   ;;  %s567_s1 = inlined_call_operand.hbm [shape: bf16[128,384], index: 1, kind: input, shape index: {}]   ;;  %s568_s2 = inlined_call_operand.hbm [shape: bf16[16,384], index: 2, kind: output, shape index: {}]  }
   0x1   :  { %8 = vsyncpa [#allocation7], 0 }
   0x2   :  { %9 = vsyncpa [#allocation5], 0  ;;  %s14_s11 = sshll.u32 %s566_s0, 4  ;;  %s529_s12 = smov [#allocation3]   ;;  %s15_s11 = int_to_ptr.hbm [resolvable:$true] %s14_s11 }
   0x3   :  { %s16_s13 = sshll.u32 %s529_s12, 4  ;;  %s27_s16 = sshll.u32 %s567_s1, 4  ;;  %s17_s13 = int_to_ptr.vmem [resolvable:$true] %s16_s13  ;;  %s28_s16 = int_to_ptr.hbm [resolvable:$true] %s27_s16 }
   0x4   :  { %s530_s17 = smov 64   ;;  %s531_s18 = smov 4  }
   0x5   :  { %22 = dma.hbm_to_vmem [thread:$0]  %s15_s11, 128, %s17_s13, [#allocation4], %s530_s17, %s530_s17, %s531_s18  }
   0x6   :  { %s532_s19 = smov [#allocation6]   ;;  %s533_s21 = smov 192  }
   0x7   :  { %s29_s20 = sshll.u32 %s532_s19, 4  ;;  %s534_s22 = smov 12   ;;  %s30_s20 = int_to_ptr.vmem [resolvable:$true] %s29_s20 }
   0x8   :  { %35 = dma.hbm_to_vmem [thread:$0]  %s28_s16, 3072, %s30_s20, [#allocation7], %s533_s21, %s533_s21, %s534_s22  }
   0x9   :  { %523 = dma.done.wait [#allocation4], 128  }
   0xa   :  { %524 = vsyncadd [#allocation4], 4294967168 }
   0xb   :  { %525 = dma.done.wait [#allocation7], 3072  }
   0xc   :  { %526 = vsyncadd [#allocation7], 4294964224  ;;  %v409_v0 = vld [vmem:[#allocation6 + $0xa8] sm:$0xf]  ;;  %v442_v1 = vld [vmem:[#allocation6 + $0xb0] sm:$0xf0] }
   0xd   :  { %v441_v2 = vld [vmem:[#allocation6 + $0xac] sm:$0xf]  ;;  %v410_v3 = vor.u32 %v442_v1, %v409_v0  ;;  %v411_v4 = vld [vmem:[#allocation6 + $0xb4] sm:$0xf0]  ;;  %v417_v5 = vld [vmem:[#allocation6 + $0xb0] sm:$0xf] }
   0xe   :  { %v443_v6 = vld [vmem:[#allocation6 + $0xb8] sm:$0xf0]  ;;  %v414_v7 = vor.u32 %v441_v2, %v411_v4  ;;  %v397_v9 = vld [vmem:[#allocation6 + $0x90] sm:$0xf]  ;;  %v438_v11 = vld [vmem:[#allocation6 + $0x94] sm:$0xf] }
   0xf   :  { %v418_v8 = vor.u32 %v443_v6, %v417_v5  ;;  %v439_v10 = vld [vmem:[#allocation6 + $0x98] sm:$0xf0]  ;;  %228 = vmatpush.bf16.msra.mxu0 %v410_v3  ;;  %v399_v13 = vld [vmem:[#allocation6 + $0x9c] sm:$0xf0]  ;;  %v405_v14 = vld [vmem:[#allocation6 + $0x98] sm:$0xf] }
  0x10   :  { %v398_v12 = vor.u32 %v439_v10, %v397_v9  ;;  %v440_v15 = vld [vmem:[#allocation6 + $0xa0] sm:$0xf0]  ;;  %242 = vmatpush.bf16.msra.mxu1 %v414_v7  ;;  %v402_v16 = vor.u32 %v438_v11, %v399_v13  ;;  %v385_v18 = vld [vmem:[#allocation6 + $0x78] sm:$0xf]  ;;  %v435_v20 = vld [vmem:[#allocation6 + $0x7c] sm:$0xf] }
  0x11   :  { %256 = vmatpush.bf16.msra.mxu2 %v418_v8  ;;  %v406_v17 = vor.u32 %v440_v15, %v405_v14  ;;  %v436_v19 = vld [vmem:[#allocation6 + $0x80] sm:$0xf0]  ;;  %v387_v21 = vld [vmem:[#allocation6 + $0x84] sm:$0xf0]  ;;  %v393_v22 = vld [vmem:[#allocation6 + $0x80] sm:$0xf] }
  0x12   :  { %v437_v23 = vld [vmem:[#allocation6 + $0x88] sm:$0xf0]  ;;  %v386_v24 = vor.u32 %v436_v19, %v385_v18  ;;  %v390_v25 = vor.u32 %v435_v20, %v387_v21  ;;  %v373_v27 = vld [vmem:[#allocation6 + $0x60] sm:$0xf]  ;;  %v432_v29 = vld [vmem:[#allocation6 + $0x64] sm:$0xf] }
  0x13   :  { %229 = vmatpush.bf16.msra.mxu0 %v398_v12  ;;  %v394_v26 = vor.u32 %v437_v23, %v393_v22  ;;  %v433_v28 = vld [vmem:[#allocation6 + $0x68] sm:$0xf0]  ;;  %v375_v30 = vld [vmem:[#allocation6 + $0x6c] sm:$0xf0]  ;;  %v381_v31 = vld [vmem:[#allocation6 + $0x68] sm:$0xf] }
  0x14   :  { %243 = vmatpush.bf16.msra.mxu1 %v402_v16  ;;  %v434_v32 = vld [vmem:[#allocation6 + $0x70] sm:$0xf0]  ;;  %v374_v33 = vor.u32 %v433_v28, %v373_v27  ;;  %v378_v34 = vor.u32 %v432_v29, %v375_v30  ;;  %v361_v36 = vld [vmem:[#allocation6 + $0x48] sm:$0xf]  ;;  %v429_v38 = vld [vmem:[#allocation6 + $0x4c] sm:$0xf] }
  0x15   :  { %257 = vmatpush.bf16.msra.mxu2 %v406_v17  ;;  %v382_v35 = vor.u32 %v434_v32, %v381_v31  ;;  %v430_v37 = vld [vmem:[#allocation6 + $0x50] sm:$0xf0]  ;;  %v363_v39 = vld [vmem:[#allocation6 + $0x54] sm:$0xf0]  ;;  %v369_v40 = vld [vmem:[#allocation6 + $0x50] sm:$0xf] }
  0x16   :  { %v431_v41 = vld [vmem:[#allocation6 + $0x58] sm:$0xf0]  ;;  %v362_v42 = vor.u32 %v430_v37, %v361_v36  ;;  %v366_v43 = vor.u32 %v429_v38, %v363_v39  ;;  %v349_v45 = vld [vmem:[#allocation6 + $0x30] sm:$0xf]  ;;  %v426_v47 = vld [vmem:[#allocation6 + $0x34] sm:$0xf] }
  0x17   :  { %230 = vmatpush.bf16.msra.mxu0 %v386_v24  ;;  %v370_v44 = vor.u32 %v431_v41, %v369_v40  ;;  %v427_v46 = vld [vmem:[#allocation6 + $0x38] sm:$0xf0]  ;;  %v351_v48 = vld [vmem:[#allocation6 + $0x3c] sm:$0xf0]  ;;  %v357_v49 = vld [vmem:[#allocation6 + $0x38] sm:$0xf] }
  0x18   :  { %244 = vmatpush.bf16.msra.mxu1 %v390_v25  ;;  %v428_v50 = vld [vmem:[#allocation6 + $0x40] sm:$0xf0]  ;;  %v350_v51 = vor.u32 %v427_v46, %v349_v45  ;;  %v354_v52 = vor.u32 %v426_v47, %v351_v48  ;;  %v337_v54 = vld [vmem:[#allocation6 + $0x18] sm:$0xf]  ;;  %v423_v56 = vld [vmem:[#allocation6 + $0x1c] sm:$0xf] }
  0x19   :  { %258 = vmatpush.bf16.msra.mxu2 %v394_v26  ;;  %v358_v53 = vor.u32 %v428_v50, %v357_v49  ;;  %v424_v55 = vld [vmem:[#allocation6 + $0x20] sm:$0xf0]  ;;  %v339_v57 = vld [vmem:[#allocation6 + $0x24] sm:$0xf0]  ;;  %v345_v58 = vld [vmem:[#allocation6 + $0x20] sm:$0xf] }
  0x1a   :  { %v425_v59 = vld [vmem:[#allocation6 + $0x28] sm:$0xf0]  ;;  %v338_v60 = vor.u32 %v424_v55, %v337_v54  ;;  %v342_v61 = vor.u32 %v423_v56, %v339_v57  ;;  %v325_v63 = vld [vmem:[#allocation6] sm:$0xf]  ;;  %v420_v1 = vld [vmem:[#allocation6 + $0x4] sm:$0xf] }
  0x1b   :  { %231 = vmatpush.bf16.msra.mxu0 %v374_v33  ;;  %v346_v62 = vor.u32 %v425_v59, %v345_v58  ;;  %v421_v0 = vld [vmem:[#allocation6 + $0x8] sm:$0xf0]  ;;  %v327_v2 = vld [vmem:[#allocation6 + $0xc] sm:$0xf0]  ;;  %v333_v3 = vld [vmem:[#allocation6 + $0x8] sm:$0xf] }
  0x1c   :  { %245 = vmatpush.bf16.msra.mxu1 %v378_v34  ;;  %v422_v4 = vld [vmem:[#allocation6 + $0x10] sm:$0xf0]  ;;  %v326_v5 = vor.u32 %v421_v0, %v325_v63  ;;  %v330_v6 = vor.u32 %v420_v1, %v327_v2  ;;  %v419_v8 = vld [vmem:[#allocation3] sm:$0xff]  ;;  %s535_s0 = smov [#allocation8]   ;;  %s305_s25 = sshll.u32 %s568_s2, 4  ;;  %s306_s25 = int_to_ptr.hbm [resolvable:$true] %s305_s25 }
  0x1d   :  { %259 = vmatpush.bf16.msra.mxu2 %v382_v35  ;;  %v334_v7 = vor.u32 %v422_v4, %v333_v3  ;;  %s303_s1 = sshll.u32 %s535_s0, 4  ;;  %s304_s1 = int_to_ptr.vmem [resolvable:$true] %s303_s1 }
  0x1f   :  { %232 = vmatpush.bf16.msra.mxu0 %v362_v42 }
  0x20   :  { %246 = vmatpush.bf16.msra.mxu1 %v366_v43 }
  0x21   :  { %260 = vmatpush.bf16.msra.mxu2 %v370_v44 }
  0x23   :  { %233 = vmatpush.bf16.msra.mxu0 %v350_v51 }
  0x24   :  { %247 = vmatpush.bf16.msra.mxu1 %v354_v52 }
  0x25   :  { %261 = vmatpush.bf16.msra.mxu2 %v358_v53 }
  0x27   :  { %234 = vmatpush.bf16.msra.mxu0 %v338_v60 }
  0x28   :  { %248 = vmatpush.bf16.msra.mxu1 %v342_v61 }
  0x29   :  { %262 = vmatpush.bf16.msra.mxu2 %v346_v62 }
  0x2b   :  { %235 = vmatpush.bf16.msra.mxu0 %v326_v5 }
  0x2c   :  { %249 = vmatpush.bf16.msra.mxu1 %v330_v6 }
  0x2d   :  { %263 = vmatpush.bf16.msra.mxu2 %v334_v7 }
  0x2e   :  { %236 = vmatmul.bf16.vlgmr.msra.gmra.mxu0 %v419_v8 }
  0x2f   :  { %250 = vmatmul.bf16.vlgmr.msra.gmra.mxu1 %v419_v8 }
  0x30   :  { %264 = vmatmul.bf16.vlgmr.msra.gmra.mxu2 %v419_v8 }
  0xab   :  { %v237_v9 = vpop.f32.mrf.mxu0 }
  0xac   :  { %v251_v10 = vpop.f32.mrf.mxu1 }
  0xad   :  { %v291_v11 = vpack.c.bf16 %v251_v10, %v237_v9 }
  0xaf   :  { %295 = vst [vmem:[#allocation8] sm:$0xff] %v291_v11 }
  0xb3   :  { %v265_v12 = vpop.f32.mrf.mxu2  ;;  %v239_v14 = vpop.f32.mrf.mxu0 }
  0xb4   :  { %v292_v13 = vpack.c.bf16 %v265_v12, %v265_v12  ;;  %v253_v15 = vpop.f32.mrf.mxu1 }
  0xb5   :  { %v293_v16 = vpack.c.bf16 %v253_v15, %v239_v14 }
  0xb6   :  { %296 = vst [vmem:[#allocation8 + $0x8] sm:$0xf] %v292_v13 }
  0xb7   :  { %297 = vst [vmem:[#allocation8 + $0xc] sm:$0xff] %v293_v16 }
  0xbb   :  { %v267_v17 = vpop.f32.mrf.mxu2 }
  0xbc   :  { %v294_v18 = vpack.c.bf16 %v267_v17, %v267_v17 }
  0xbe   :  { %298 = vst [vmem:[#allocation8 + $0x14] sm:$0xf] %v294_v18 }
  0xbf   :  { %311 = dma.vmem_to_hbm [thread:$0]  %s304_s1, 384, %s306_s25, [#allocation5], %s533_s21, %s533_s21, %s534_s22  }
  0xc0   :  { %527 = dma.done.wait [#allocation5], 384  }
  0xc1   :  { %528 = vsyncadd [#allocation5], 4294966912 }
  0xc2   :  { %316 = vsyncpa [#allocation4], 1 }
  0xc3   :  { %317 = vsyncpa [#allocation7], 1 }
  0xc4   :  { %318 = vsyncpa [#allocation5], 1 }

</bundles_post_ra>
